<compile_context>
chip_gen: v5e
topology: v5e:2x2
jax: 0.10.0
libtpu: 0.0.40
codegen_flags: <defaults>
</compile_context>

<pallas_src>
import jax
import jax.numpy as jnp
from jax.experimental import pallas as pl
from jax.experimental.pallas import tpu as pltpu


def _round_up(v, m):
    return (v + m - 1) // m * m


def _maj3fc_matmul_kernel(a_ref, b_ref, o_ref, acc_ref):
    # Standard tiled matmul with an f32 VMEM accumulator; K is the last grid axis.
    @pl.when(pl.program_id(2) == 0)
    def _():
        acc_ref[...] = jnp.zeros_like(acc_ref)

    acc_ref[...] += jnp.dot(a_ref[...], b_ref[...],
                            preferred_element_type=jnp.float32)

    @pl.when(pl.program_id(2) == pl.num_programs(2) - 1)
    def _():
        o_ref[...] = (1.125 * acc_ref[...]).astype(o_ref.dtype)


def maj3fc(x, weight, *, tm=128, tn=128, tk=512):
    """x: (B, c_in) f32, weight: (c_out, c_in) f32 -> (B, c_out) f32."""
    B, c_in = x.shape
    c_out, c_in_w = weight.shape
    assert c_in == c_in_w and c_in % 3 == 0, "c_in must be divisible by 3"
    G = c_in // 3

    # Binarize once in the wrapper (one-time memory-bound pass; weights could be
    # cached across calls for inference).
    xb = jnp.sign(x)
    wb = jnp.sign(weight)

    # Per-group triple products (values are +-1, exact in bf16).
    xp = jnp.prod(xb.reshape(B, G, 3), axis=2)        # (B, G)
    wp = jnp.prod(wb.reshape(c_out, G, 3), axis=2)    # (c_out, G)

    # out = 1.125 * (xb @ wb.T - xp @ wp.T) = 1.125 * [xb, -xp] @ [wb, wp].T
    a = jnp.concatenate([xb, -xp], axis=1).astype(jnp.bfloat16)      # (B, K)
    bt = jnp.concatenate([wb, wp], axis=1).astype(jnp.bfloat16).T    # (K, c_out)
    K = c_in + G

    # Tile sizes: bf16 operands -> sublane dims multiples of 16, lane dims
    # multiples of 128; output tiles lane-dense (tn multiple of 128).
    tm = min(tm, _round_up(B, 16))
    tk = min(tk, _round_up(K, 128))
    Mp = _round_up(B, tm)
    Np = _round_up(c_out, tn)
    Kp = _round_up(K, tk)

    # Zero-pad to tile multiples (zeros along K contribute nothing to the dot;
    # padded M/N rows/cols are sliced off below).
    a_p = jnp.zeros((Mp, Kp), jnp.bfloat16).at[:B, :K].set(a)
    b_p = jnp.zeros((Kp, Np), jnp.bfloat16).at[:K, :c_out].set(bt)

    grid = (Mp // tm, Np // tn, Kp // tk)

    out_p = pl.pallas_call(
        _maj3fc_matmul_kernel,
        out_shape=jax.ShapeDtypeStruct((Mp, Np), jnp.float32),
        grid_spec=pltpu.PrefetchScalarGridSpec(
            num_scalar_prefetch=0,
            grid=grid,
            in_specs=[
                pl.BlockSpec((tm, tk), lambda i, j, k: (i, k)),
                pl.BlockSpec((tk, tn), lambda i, j, k: (k, j)),
            ],
            out_specs=pl.BlockSpec((tm, tn), lambda i, j, k: (i, j)),
            scratch_shapes=[pltpu.VMEM((tm, tn), jnp.float32)],
        ),
        compiler_params=pltpu.CompilerParams(
            dimension_semantics=("parallel", "parallel", "arbitrary")),
    )(a_p, b_p)

    return out_p[:B, :c_out]


def maj3fc_reference(x, weight):
    """Plain-JAX reference mirroring the PyTorch forward exactly."""
    xb = jnp.sign(x)
    wb = jnp.sign(weight)
    B, c_in = x.shape
    c_out = weight.shape[0]
    G = c_in // 3
    prod = jnp.einsum('bj,cj->bcj', xb, wb)                    # (B, C, c_in)
    s3 = jnp.sum(prod.reshape(B, c_out, G, 3), axis=3)         # (B, C, G)
    return 2.25 * jnp.sum(jnp.clip(s3, -1.0, 1.0), axis=2)     # (B, C)


if __name__ == "__main__":
    # Small shapes that still exercise the N and K grid axes.
    B, c_in, c_out = 24, 768, 160   # c_in divisible by 3

    key = jax.random.PRNGKey(0)
    kx, kw = jax.random.split(key)

    x = jax.random.normal(kx, (B, c_in), dtype=jnp.float32)
    stdv = 1.0 / (c_out * c_in) ** 0.5
    weight = jax.random.uniform(kw, (c_out, c_in), dtype=jnp.float32,
                                minval=-stdv, maxval=stdv)

    out = jax.block_until_ready(maj3fc(x, weight))
    ref = maj3fc_reference(x, weight)

    assert out.shape == (B, c_out)
    assert jnp.allclose(out, ref, atol=1e-3, rtol=1e-5), "mismatch vs reference"

    print("KERNEL_OK")
</pallas_src>

<mosaic_0001>
module attributes {stable_mosaic.version = 11 : i64} {
  func.func @_maj3fc_matmul_kernel(%arg0: i32, %arg1: i32, %arg2: i32, %arg3: memref<32x512xbf16, #tpu.memory_space<vmem>>, %arg4: memref<512x128xbf16, #tpu.memory_space<vmem>>, %arg5: memref<32x128xf32, #tpu.memory_space<vmem>>, %arg6: memref<32x128xf32, #tpu.memory_space<vmem>>) attributes {dimension_semantics = [#tpu.dimension_semantics<parallel>, #tpu.dimension_semantics<parallel>, #tpu.dimension_semantics<arbitrary>], iteration_bounds = array<i64: 1, 2, 2>, scalar_prefetch = 0 : i64, scratch_operands = 1 : i64, tpu.core_type = #tpu.core_type<tc>, window_params = [{transform_indices = @transform_0, window_bounds = array<i64: 32, 512>}, {transform_indices = @transform_1, window_bounds = array<i64: 512, 128>}, {transform_indices = @transform_2, window_bounds = array<i64: 32, 128>}]} {
    %c0_i32 = arith.constant 0 : i32
    %0 = arith.cmpi eq, %arg2, %c0_i32 : i32
    %1 = arith.extui %0 : i1 to i32
    %c0_i32_0 = arith.constant 0 : i32
    %2 = arith.cmpi ne, %1, %c0_i32_0 : i32
    scf.if %2 {
      %cst_9 = arith.constant 0.000000e+00 : f32
      %12 = vector.broadcast %cst_9 : f32 to vector<32x128xf32>
      %c0_10 = arith.constant 0 : index
      %c0_11 = arith.constant 0 : index
      %13 = vector.load %arg6[%c0_10, %c0_11] : memref<32x128xf32, #tpu.memory_space<vmem>>, vector<32x128xf32>
      tpu.vector_store %arg6[%c0_10, %c0_11], %12 {strides = array<i32>} : memref<32x128xf32, #tpu.memory_space<vmem>>, vector<32x128xf32>,
    } else {
    }
    %c0 = arith.constant 0 : index
    %c0_1 = arith.constant 0 : index
    %3 = vector.load %arg6[%c0, %c0_1] : memref<32x128xf32, #tpu.memory_space<vmem>>, vector<32x128xf32>
    %c0_2 = arith.constant 0 : index
    %c0_3 = arith.constant 0 : index
    %4 = vector.load %arg3[%c0_2, %c0_3] : memref<32x512xbf16, #tpu.memory_space<vmem>>, vector<32x512xbf16>
    %c0_4 = arith.constant 0 : index
    %c0_5 = arith.constant 0 : index
    %5 = vector.load %arg4[%c0_4, %c0_5] : memref<512x128xbf16, #tpu.memory_space<vmem>>, vector<512x128xbf16>
    %cst = arith.constant dense<0.000000e+00> : vector<32x128xf32>
    %6 = tpu.matmul %4, %5, %cst {dimension_numbers = #tpu.dot_dimension_numbers<[1], [0], [0], [1], [0, 0, 1, 1], [], []>} : vector<32x512xbf16>, vector<512x128xbf16>, vector<32x128xf32> -> vector<32x128xf32>
    %7 = arith.addf %3, %6 : vector<32x128xf32>
    %c0_6 = arith.constant 0 : index
    %c0_7 = arith.constant 0 : index
    %8 = vector.load %arg6[%c0_6, %c0_7] : memref<32x128xf32, #tpu.memory_space<vmem>>, vector<32x128xf32>
    tpu.vector_store %arg6[%c0_6, %c0_7], %7 {strides = array<i32>} : memref<32x128xf32, #tpu.memory_space<vmem>>, vector<32x128xf32>,
    %c1_i32 = arith.constant 1 : i32
    %9 = arith.cmpi eq, %arg2, %c1_i32 : i32
    %10 = arith.extui %9 : i1 to i32
    %c0_i32_8 = arith.constant 0 : i32
    %11 = arith.cmpi ne, %10, %c0_i32_8 : i32
    scf.if %11 {
      %c0_9 = arith.constant 0 : index
      %c0_10 = arith.constant 0 : index
      %12 = vector.load %arg6[%c0_9, %c0_10] : memref<32x128xf32, #tpu.memory_space<vmem>>, vector<32x128xf32>
      %cst_11 = arith.constant 1.125000e+00 : f32
      %13 = vector.broadcast %cst_11 : f32 to vector<32x128xf32>
      %14 = arith.mulf %13, %12 : vector<32x128xf32>
      %c0_12 = arith.constant 0 : index
      %c0_13 = arith.constant 0 : index
      %15 = vector.load %arg5[%c0_12, %c0_13] : memref<32x128xf32, #tpu.memory_space<vmem>>, vector<32x128xf32>
      tpu.vector_store %arg5[%c0_12, %c0_13], %14 {strides = array<i32>} : memref<32x128xf32, #tpu.memory_space<vmem>>, vector<32x128xf32>,
    } else {
    }
    return
  }
  func.func @transform_0(%arg0: i32, %arg1: i32, %arg2: i32) -> (i32, i32) {
    %c0_i32 = arith.constant 0 : i32
    return %arg0, %arg2 : i32, i32
  }
  func.func @transform_1(%arg0: i32, %arg1: i32, %arg2: i32) -> (i32, i32) {
    %c0_i32 = arith.constant 0 : i32
    return %arg2, %arg1 : i32, i32
  }
  func.func @transform_2(%arg0: i32, %arg1: i32, %arg2: i32) -> (i32, i32) {
    %c0_i32 = arith.constant 0 : i32
    return %arg0, %arg1 : i32, i32
  }
}

</mosaic_0001>

<bundles_post_ra>
// kernel: tpu_custom_call.1
= control target key start
LH: loop header
LB: loop body
LE: loop exit
PB: predicated region body
PF: predicated region fallthrough
CT: control target
= control target key end

     0   :  { %s1721_s0 = inlined_call_operand.hbm [shape: bf16[32,1024], index: 0, kind: input, shape index: {}]   ;;  %s1722_s1 = inlined_call_operand.hbm [shape: bf16[1024,256], index: 1, kind: input, shape index: {}]   ;;  %s1723_s2 = inlined_call_operand.hbm [shape: f32[32,256], index: 2, kind: output, shape index: {}]  }
   0x1   :  { %1730 = sst [smem:[#allocation20_spill]] %s1721_s0 }
   0x2   :  { %1731 = sst [smem:[#allocation21_spill]] %s1723_s2 }
   0x3   :  { %7 = vsyncpa [#allocation4], 0 }
   0x4   :  { %9 = vsyncpa [#allocation4 + $0x1], 0 }
   0x5   :  { %10 = vsyncpa [#allocation7], 0 }
   0x6   :  { %12 = vsyncpa [#allocation7 + $0x1], 0 }
   0x7   :  { %13 = vsyncpa [#allocation5], 0 }
   0x8   :  { %15 = vsyncpa [#allocation5 + $0x1], 0  ;;  %s1392_s9 = smov 0   ;;  %s1394_s10 = smov 0  }
   0x9   :  { %s1396_s11 = smov 0   ;;  %s1398_s12 = smov 0  }
   0xa   :  { %s1400_s13 = smov 0   ;;  %s1402_s14 = smov 0  }
   0xb   :  { %s1404_s15 = smov 0   ;;  %s1406_s16 = smov 0  }
   0xc   :  { %s1408_s17 = smov 0   ;;  %s1410_s18 = smov 0  }
   0xd   :  { %s1412_s19 = smov 0   ;;  %s1414_s20 = smov 0  }
   0xe   :  { %s1416_s21 = smov 0   ;;  %s1418_s22 = smov 0  }
   0xf LB: > { %1732 = sst [smem:[#allocation12_spill]] %s1333_s14  ;;  %s791_s23 = sadd.s32 4294967295, %s1365_s22   ;;  %s1365_s22 = sphi %s1418_s22, %s21_s22   ;;  %s1361_s21 = sphi %s1416_s21, %s1773_s21   ;;  %s1357_s20 = sphi %s1414_s20, %s1772_s20   ;;  %s1353_s19 = sphi %s1412_s19, %s1771_s19   ;;  %s1349_s18 = sphi %s1410_s18, %s1770_s18   ;;  %s1345_s17 = sphi %s1408_s17, %s1760_s17   ;;  %s1341_s16 = sphi %s1406_s16, %s1769_s16   ;;  %s1337_s15 = sphi %s1404_s15, %s1768_s15   ;;  %s1333_s14 = sphi %s1402_s14, %s1758_s14   ;;  %s1329_s13 = sphi %s1400_s13, %s1767_s13   ;;  %s1325_s12 = sphi %s1398_s12, %s1766_s12   ;;  %s1321_s11 = sphi %s1396_s11, %s1765_s11   ;;  %s1317_s10 = sphi %s1394_s10, %s1764_s10   ;;  %s1313_s9 = sphi %s1392_s9, %s1763_s9  }
  0x10   : > { %1733 = sst [smem:[#allocation13_spill]] %s1345_s17  ;;  %s33_s24 = sadd.s32 1, %s1357_s20 }
  0x11   : > { %1734 = sst [smem:[#allocation14_spill]] %s1353_s19  ;;  %p1462_p0 = scmp.ge.s32.totalorder %s33_s24, 2 }
  0x12   : > { %s49_s26 = sadd.s32 1, %s1345_s17  ;;  %p56_p1 = scmp.ne.s32.totalorder %s1345_s17, %s1341_s16 }
  0x13   : > { %p57_p2 = scmp.eq.s32.totalorder %s1365_s22, 0  ;;  %s1775_s24 = smov (%p1462_p0, %s33_s24), 0 }
  0x14   : > { %1736 = sst [smem:[#allocation15_spill]] %s1775_s24  ;;  %p62_p4 = scmp.ne.s32.totalorder %s1341_s16, %s1337_s15 }
  0x15   : > { %p1476_p3 = por %p57_p2, %p56_p1  ;;  %s1483_s28 = ssub.s32 %s1357_s20, %s1775_s24 }
  0x16   : > { %p1485_p5 = scmp.eq.s32.totalorder %s791_s23, 0  ;;  %p47_p6 = scmp.eq.s32.totalorder %s1483_s28, 0 }
  0x17   : > { %p1490_p7 = scmp.eq.s32.totalorder %s791_s23, 3  ;;  %p1726_p9 = scmp.lt.s32.totalorder %s1365_s22, 4 }
  0x18   : > { %p1496_p8 = por %p1485_p5, %p62_p4  ;;  %s142_s5 = sand.u32 1, %s1345_s17  }
  0x19   : > { %s1501_s4 = scalar_select %p47_p6, %s1345_s17, %s49_s26  }
  0x1a   : > { %s795_s6 = sshll.u32 %s142_s5, 6  ;;  %s972_s7 = sshll.u32 %s1357_s20, 4 }
  0x1b   : > { %1741 = sst [smem:[#allocation16_spill]] %s1501_s4  ;;  %s146_s24 = scalar_lea.vmem [#allocation3], %s795_s6 }
  0x1c   : > { %s1742_s0 = sld [smem:[#allocation20_spill]]  ;;  %s157_s2 = sshll.u32 %s146_s24, 4  ;;  %s158_s2 = int_to_ptr.vmem [resolvable:$true] %s157_s2 }
  0x1d   : > { %p1021_p10 = pnand %p1726_p9, %p1476_p3  ;;  %s143_s26 = scalar_lea.sflag [#allocation4], %s142_s5 }
  0x1e   : > { %s1368_s6 = smov 256   ;;  %s1369_s8 = smov 16  }
  0x1f   : > { %p802_p11 = scmp.ge.s32.totalorder %s1365_s22, 1  ;;  %p189_p12 = scmp.lt.s32.totalorder %s1365_s22, 5 }
  0x20   : > { %s792_s27 = sadd.s32 4294967294, %s1365_s22   ;;  %s36_s5 = sadd.s32 1, %s1361_s21 }
  0x21   : > { %p1515_p13 = pnand %p802_p11, %p189_p12  ;;  %s77_s15 = sadd.s32 1, %s1333_s14 }
  0x22   : > { %s154_s23 = scalar_lea.hbm %s1742_s0, %s972_s7  ;;  %s1367_s7 = smov 512  }
  0x23   : > { %s155_s19 = sshll.u32 %s154_s23, 4  ;;  %s1777_s5 = smov (!%p1462_p0, %s36_s5), %s1361_s21  ;;  %s156_s19 = int_to_ptr.hbm [resolvable:$true] %s155_s19 }
  0x24   : > { %1023 = dma.hbm_to_vmem [thread:$0]  (!%p1021_p10), %s156_s19, 1024, %s158_s2, %s143_s26, %s1367_s7, %s1368_s6, %s1369_s8  }
  0x25   : > { %p84_p1 = scmp.ne.s32.totalorder %s1333_s14, %s1329_s13  ;;  %p90_p3 = scmp.ne.s32.totalorder %s1329_s13, %s1325_s12 }
  0x26   : > { %p38_p4 = scmp.ge.s32.totalorder %s1777_s5, 2  ;;  %s105_s2 = sadd.s32 1, %s1321_s11 }
  0x27   : > { %p1532_p6 = por %p84_p1, %p57_p2  ;;  %p1538_p10 = por %p90_p3, %p1485_p5 }
  0x28   : > { %s1779_s5 = smov (%p38_p4, %s1777_s5), 0  ;;  %p115_p0 = scmp.ne.s32.totalorder %s1321_s11, %s1317_s10 }
  0x29   : > { %1746 = sst [smem:[#allocation17_spill]] %s1779_s5  ;;  %p121_p11 = scmp.ne.s32.totalorder %s1317_s10, %s1313_s9 }
  0x2a   : > { %s73_s12 = ssub.s32 %s1361_s21, %s1779_s5  ;;  %p122_p12 = scmp.eq.s32.totalorder %s792_s27, 3 }
  0x2b   : > { %s74_s25 = sor.u32 %s73_s12, %s1483_s28  ;;  %p103_p2 = scmp.eq.s32.totalorder %s73_s12, 0 }
  0x2c   : > { %p75_p1 = scmp.eq.s32.totalorder %s74_s25, 0  ;;  %p1553_p9 = por %p1490_p7, %p115_p0 }
  0x2d   : > { %s1558_s26 = scalar_select %p103_p2, %s1321_s11, %s105_s2  }
  0x2e   : > { %s1561_s7 = scalar_select %p75_p1, %s1333_s14, %s77_s15  }
  0x2f   : > { %1748 = sst [smem:[#allocation18_spill]] %s1558_s26  ;;  %p1563_p5 = por %p122_p12, %p121_p11 }
  0x30   : > { %1749 = sst [smem:[#allocation19_spill]] %s1561_s7  ;;  %s167_s8 = sand.u32 1, %s1333_s14  }
  0x31   : > { %s798_s27 = sshll.u32 %s167_s8, 8  ;;  %s973_s28 = sshll.u32 %s1357_s20, 7 }
  0x32   : > { %s176_s0 = sadd.s32 %s1361_s21, %s973_s28  ;;  %s171_s5 = scalar_lea.vmem [#allocation6], %s798_s27 }
  0x33   : > { %s181_s12 = sshll.u32 %s171_s5, 4  ;;  %s801_s25 = sshll.u32 %s176_s0, 2  ;;  %s182_s12 = int_to_ptr.vmem [resolvable:$true] %s181_s12 }
  0x34   : > { %s178_s17 = scalar_lea.hbm %s1722_s1, %s801_s25  ;;  %p1751_p7 = scmp.lt.s32.totalorder %s1365_s22, 4 }
  0x35   : > { %s179_s15 = sshll.u32 %s178_s17, 4  ;;  %s168_s2 = scalar_lea.sflag [#allocation7], %s167_s8  ;;  %s180_s15 = int_to_ptr.hbm [resolvable:$true] %s179_s15 }
  0x36   : > { %p1024_p3 = pnand %p1751_p7, %p1532_p6  ;;  %s1370_s7 = smov 128  }
  0x37   : > { %s1371_s26 = smov 64   ;;  %s1372_s14 = smov 4  }
  0x38   : > { %1026 = dma.hbm_to_vmem [thread:$0]  (!%p1024_p3), %s180_s15, 4096, %s182_s12, %s168_s2, %s1370_s7, %s1371_s26, %s1372_s14  }
  0x39   : > { %193 = sbr.rel (%p1515_p13) target bundleno = 309 (0x135), region = 28  ;;  %s195_s0 = sand.u32 (!%p1515_p13), 1, %s1341_s16  }
  0x3a   : > { %s803_s5 = sshll.u32 (!%p1515_p13), %s195_s0, 6  ;;  %s196_s27 = scalar_lea.sflag (!%p1515_p13), [#allocation4], %s195_s0 }
  0x3b   : > { %s1580_s4 = scalar_lea.vmem (!%p1515_p13), [#allocation3], %s803_s5 }
  0x3e   : > { %1300 = dma.done.wait (%p1496_p8), %s196_s27, 1024  }
  0x3f   : > { %1302 = vsyncadd (%p1496_p8), %s196_s27, 4294966272  ;;  %s205_s17 = sand.u32 1, %s1329_s13  }
  0x40   : > { %s804_s19 = sshll.u32 %s205_s17, 8  ;;  %s206_s14 = scalar_lea.sflag [#allocation7], %s205_s17 }
  0x41   : > { %s1587_s26 = scalar_lea.vmem [#allocation6], %s804_s19 }
  0x42   : > { %1304 = dma.done.wait (%p1538_p10), %s206_s14, 4096  }
  0x43   : > { %1306 = vsyncadd (%p1538_p10), %s206_s14, 4294963200  ;;  %s233_s24 = sand.u32 1, %s1317_s10   ;;  %p806_p8 = scmp.ne.s32.totalorder %s1349_s18, 0 }
  0x44   : > { %s805_s7 = sshll.u32 %s233_s24, 5 }
  0x45   : > { %s1596_s8 = scalar_lea.vmem [#allocation8], %s805_s7  ;;  %243 = sbr.rel (%p806_p8) target bundleno = 79 (0x4f), region = 40 }
  0x4a   : > { %v1373_v0 = vmov 0.0  }
  0x4b   : > { %244 = vst [vmem:[#allocation2 + $0x10] sm:$0xff] %v1373_v0 }
  0x4c   : > { %245 = vst [vmem:[#allocation2] sm:$0xff] %v1373_v0 }
  0x4d   : > { %246 = vst [vmem:[#allocation2 + $0x18] sm:$0xff] %v1373_v0 }
  0x4e   : > { %247 = vst [vmem:[#allocation2 + $0x8] sm:$0xff] %v1373_v0 }
  0x4f PF: > { %v989_v1 = vld [vmem:[%s1587_s26 + $0x38] sm:$0xff]  ;;  %v988_v5 = vld [vmem:[%s1587_s26 + $0x30] sm:$0xff]  ;;  %v987_v9 = vld [vmem:[%s1587_s26 + $0x28] sm:$0xff]  ;;  %p967_p13 = scmp.ne.s32.totalorder %s1349_s18, 1 }
  0x50   : > { %v997_v2 = vld [vmem:[%s1587_s26 + $0x78] sm:$0xff]  ;;  %556 = vmatpush.bf16.msra.mxu0 %v989_v1  ;;  %v996_v6 = vld [vmem:[%s1587_s26 + $0x70] sm:$0xff]  ;;  %v995_v10 = vld [vmem:[%s1587_s26 + $0x68] sm:$0xff] }
  0x51   : > { %v1005_v3 = vld [vmem:[%s1587_s26 + $0xb8] sm:$0xff]  ;;  %575 = vmatpush.bf16.msra.mxu1 %v997_v2  ;;  %v1004_v7 = vld [vmem:[%s1587_s26 + $0xb0] sm:$0xff]  ;;  %v1003_v11 = vld [vmem:[%s1587_s26 + $0xa8] sm:$0xff] }
  0x52   : > { %v1013_v4 = vld [vmem:[%s1587_s26 + $0xf8] sm:$0xff]  ;;  %594 = vmatpush.bf16.msra.mxu2 %v1005_v3  ;;  %v1012_v8 = vld [vmem:[%s1587_s26 + $0xf0] sm:$0xff]  ;;  %v1011_v12 = vld [vmem:[%s1587_s26 + $0xe8] sm:$0xff] }
  0x53   : > { %613 = vmatpush.bf16.msra.mxu3 %v1013_v4  ;;  %v986_v13 = vld [vmem:[%s1587_s26 + $0x20] sm:$0xff]  ;;  %v985_v17 = vld [vmem:[%s1587_s26 + $0x18] sm:$0xff]  ;;  %v984_v21 = vld [vmem:[%s1587_s26 + $0x10] sm:$0xff] }
  0x54   : > { %557 = vmatpush.bf16.msra.mxu0 %v988_v5  ;;  %v994_v14 = vld [vmem:[%s1587_s26 + $0x60] sm:$0xff]  ;;  %v993_v18 = vld [vmem:[%s1587_s26 + $0x58] sm:$0xff]  ;;  %v992_v22 = vld [vmem:[%s1587_s26 + $0x50] sm:$0xff] }
  0x55   : > { %576 = vmatpush.bf16.msra.mxu1 %v996_v6  ;;  %v1002_v15 = vld [vmem:[%s1587_s26 + $0xa0] sm:$0xff]  ;;  %v1001_v19 = vld [vmem:[%s1587_s26 + $0x98] sm:$0xff]  ;;  %v1000_v23 = vld [vmem:[%s1587_s26 + $0x90] sm:$0xff] }
  0x56   : > { %595 = vmatpush.bf16.msra.mxu2 %v1004_v7  ;;  %v1010_v16 = vld [vmem:[%s1587_s26 + $0xe0] sm:$0xff]  ;;  %v1009_v20 = vld [vmem:[%s1587_s26 + $0xd8] sm:$0xff]  ;;  %v1008_v24 = vld [vmem:[%s1587_s26 + $0xd0] sm:$0xff] }
  0x57   : > { %614 = vmatpush.bf16.msra.mxu3 %v1012_v8  ;;  %v983_v25 = vld [vmem:[%s1587_s26 + $0x8] sm:$0xff]  ;;  %v982_v29 = vld [vmem:[%s1587_s26] sm:$0xff]  ;;  %v976_v34 = vld [vmem:[%s1580_s4 + $0xc] sm:$0xf0] }
  0x58   : > { %558 = vmatpush.bf16.msra.mxu0 %v987_v9  ;;  %v991_v26 = vld [vmem:[%s1587_s26 + $0x48] sm:$0xff]  ;;  %v990_v30 = vld [vmem:[%s1587_s26 + $0x40] sm:$0xff]  ;;  %v811_v36 = vld [vmem:[%s1580_s4 + $0x10] sm:$0xf0] }
  0x59   : > { %577 = vmatpush.bf16.msra.mxu1 %v995_v10  ;;  %v999_v27 = vld [vmem:[%s1587_s26 + $0x88] sm:$0xff]  ;;  %v998_v31 = vld [vmem:[%s1587_s26 + $0x80] sm:$0xff]  ;;  %v977_v38 = vld [vmem:[%s1580_s4 + $0x14] sm:$0xf0] }
  0x5a   : > { %596 = vmatpush.bf16.msra.mxu2 %v1003_v11  ;;  %v1007_v28 = vld [vmem:[%s1587_s26 + $0xc8] sm:$0xff]  ;;  %v1006_v32 = vld [vmem:[%s1587_s26 + $0xc0] sm:$0xff]  ;;  %v819_v40 = vld [vmem:[%s1580_s4 + $0x18] sm:$0xf0] }
  0x5b   : > { %615 = vmatpush.bf16.msra.mxu3 %v1011_v12  ;;  %v809_v33 = vld [vmem:[%s1580_s4] sm:$0xf]  ;;  %v974_v35 = vld [vmem:[%s1580_s4 + $0x4] sm:$0xf]  ;;  %v817_v37 = vld [vmem:[%s1580_s4 + $0x8] sm:$0xf] }
  0x5c   : > { %559 = vmatpush.bf16.msra.mxu0 %v986_v13  ;;  %v975_v39 = vld [vmem:[%s1580_s4 + $0xc] sm:$0xf]  ;;  %v810_v41 = vor.u32 %v976_v34, %v809_v33  ;;  %v814_v42 = vor.u32 %v974_v35, %v811_v36  ;;  %v818_v43 = vor.u32 %v977_v38, %v817_v37  ;;  %v825_v45 = vld [vmem:[%s1580_s4 + $0x20] sm:$0xf]  ;;  %v980_v46 = vld [vmem:[%s1580_s4 + $0x2c] sm:$0xf0] }
  0x5d   : > { %578 = vmatpush.bf16.msra.mxu1 %v994_v14  ;;  %v822_v44 = vor.u32 %v975_v39, %v819_v40  ;;  %v978_v47 = vld [vmem:[%s1580_s4 + $0x24] sm:$0xf]  ;;  %v827_v48 = vld [vmem:[%s1580_s4 + $0x30] sm:$0xf0]  ;;  %v833_v49 = vld [vmem:[%s1580_s4 + $0x28] sm:$0xf]  ;;  %v826_v53 = vor.u32 %v980_v46, %v825_v45 }
  0x5e   : > { %597 = vmatpush.bf16.msra.mxu2 %v1002_v15  ;;  %v981_v50 = vld [vmem:[%s1580_s4 + $0x34] sm:$0xf0]  ;;  %v979_v51 = vld [vmem:[%s1580_s4 + $0x2c] sm:$0xf]  ;;  %v835_v52 = vld [vmem:[%s1580_s4 + $0x38] sm:$0xf0]  ;;  %v830_v54 = vor.u32 %v978_v47, %v827_v48 }
  0x5f   : > { %616 = vmatpush.bf16.msra.mxu3 %v1010_v16  ;;  %v834_v55 = vor.u32 %v981_v50, %v833_v49  ;;  %v838_v56 = vor.u32 %v979_v51, %v835_v52  ;;  %v248_v1 = vld [vmem:[#allocation2 + $0x10] sm:$0xff]  ;;  %v249_v8 = vld [vmem:[#allocation2] sm:$0xff] }
  0x60   : > { %560 = vmatpush.bf16.msra.mxu0 %v985_v17  ;;  %v250_v17 = vld [vmem:[#allocation2 + $0x18] sm:$0xff] }
  0x61   : > { %579 = vmatpush.bf16.msra.mxu1 %v993_v18 }
  0x62   : > { %598 = vmatpush.bf16.msra.mxu2 %v1001_v19 }
  0x63   : > { %617 = vmatpush.bf16.msra.mxu3 %v1009_v20 }
  0x64   : > { %561 = vmatpush.bf16.msra.mxu0 %v984_v21 }
  0x65   : > { %580 = vmatpush.bf16.msra.mxu1 %v992_v22 }
  0x66   : > { %599 = vmatpush.bf16.msra.mxu2 %v1000_v23 }
  0x67   : > { %618 = vmatpush.bf16.msra.mxu3 %v1008_v24 }
  0x68   : > { %562 = vmatpush.bf16.msra.mxu0 %v983_v25  ;;  %v251_v25 = vld [vmem:[#allocation2 + $0x8] sm:$0xff] }
  0x69   : > { %581 = vmatpush.bf16.msra.mxu1 %v991_v26 }
  0x6a   : > { %600 = vmatpush.bf16.msra.mxu2 %v999_v27 }
  0x6b   : > { %619 = vmatpush.bf16.msra.mxu3 %v1007_v28 }
  0x6c   : > { %563 = vmatpush.bf16.msra.mxu0 %v982_v29 }
  0x6d   : > { %582 = vmatpush.bf16.msra.mxu1 %v990_v30 }
  0x6e   : > { %601 = vmatpush.bf16.msra.mxu2 %v998_v31 }
  0x6f   : > { %620 = vmatpush.bf16.msra.mxu3 %v1006_v32  ;;  %564 = vmatmul.bf16.vlgmr.msra.gmra.mxu0 %v810_v41 }
  0x70   : > { %583 = vmatmul.bf16.vlgmr.msra.gmra.mxu1 %v814_v42 }
  0x71   : > { %602 = vmatmul.bf16.vlgmr.msra.gmra.mxu2 %v818_v43 }
  0x72   : > { %621 = vmatmul.bf16.vlgmr.msra.gmra.mxu3 %v822_v44 }
  0x7f   : > { %569 = vmatmul.bf16.gmra.mxu0 %v826_v53 }
  0x80   : > { %588 = vmatmul.bf16.gmra.mxu1 %v830_v54 }
  0x81   : > { %607 = vmatmul.bf16.gmra.mxu2 %v834_v55 }
  0x82   : > { %626 = vmatmul.bf16.gmra.mxu3 %v838_v56 }
  0xec   : > { %v565_v57 = vpop.f32.mrf.mxu0 }
  0xed   : > { %v584_v58 = vpop.f32.mrf.mxu1 }
  0xee   : > { %v585_v59 = vadd.f32 %v584_v58, %v565_v57 }
  0xf4   : > { %v603_v60 = vpop.f32.mrf.mxu2  ;;  %v567_v63 = vpop.f32.mrf.mxu0 }
  0xf5   : > { %v622_v61 = vpop.f32.mrf.mxu3  ;;  %v604_v62 = vadd.f32 %v603_v60, %v585_v59  ;;  %v586_v0 = vpop.f32.mrf.mxu1 }
  0xf6   : > { %v587_v4 = vadd.f32 %v586_v0, %v567_v63 }
  0xf7   : > { %v623_v2 = vadd.f32 %v622_v61, %v604_v62 }
  0xf9   : > { %v632_v3 = vadd.f32 %v623_v2, %v248_v1 }
  0xfb   : > { %636 = vst [vmem:[#allocation2 + $0x10] sm:$0xff] %v632_v3 }
  0xfc   : > { %v605_v5 = vpop.f32.mrf.mxu2  ;;  %v570_v9 = vpop.f32.mrf.mxu0 }
  0xfd   : > { %v624_v6 = vpop.f32.mrf.mxu3  ;;  %v606_v7 = vadd.f32 %v605_v5, %v587_v4  ;;  %v589_v10 = vpop.f32.mrf.mxu1 }
  0xfe   : > { %v590_v13 = vadd.f32 %v589_v10, %v570_v9 }
  0xff   : > { %v625_v11 = vadd.f32 %v624_v6, %v606_v7 }
 0x101   : > { %v633_v12 = vadd.f32 %v625_v11, %v249_v8 }
 0x103   : > { %637 = vst [vmem:[#allocation2] sm:$0xff] %v633_v12 }
 0x104   : > { %v608_v14 = vpop.f32.mrf.mxu2  ;;  %v572_v19 = vpop.f32.mrf.mxu0 }
 0x105   : > { %v627_v15 = vpop.f32.mrf.mxu3  ;;  %v609_v16 = vadd.f32 %v608_v14, %v590_v13  ;;  %v591_v20 = vpop.f32.mrf.mxu1 }
 0x106   : > { %v592_v22 = vadd.f32 %v591_v20, %v572_v19 }
 0x107   : > { %v628_v18 = vadd.f32 %v627_v15, %v609_v16 }
 0x109   : > { %v634_v21 = vadd.f32 %v628_v18, %v250_v17 }
 0x10b   : > { %638 = vst [vmem:[#allocation2 + $0x18] sm:$0xff] %v634_v21 }
 0x10c   : > { %v610_v23 = vpop.f32.mrf.mxu2 }
 0x10d   : > { %v611_v24 = vadd.f32 %v610_v23, %v592_v22  ;;  %v629_v26 = vpop.f32.mrf.mxu3 }
 0x10f   : > { %v630_v27 = vadd.f32 %v629_v26, %v611_v24  ;;  %643 = sbr.rel (%p967_p13) target bundleno = 286 (0x11e), region = 44 }
 0x111   : > { %v635_v28 = vadd.f32 %v630_v27, %v251_v25 }
 0x113   : > { %639 = vst [vmem:[#allocation2 + $0x8] sm:$0xff] %v635_v28 }
 0x114   : > { %v644_v29 = vld [vmem:[#allocation2 + $0x10] sm:$0xff]  ;;  %v645_v30 = vld [vmem:[#allocation2] sm:$0xff]  ;;  %v646_v31 = vld [vmem:[#allocation2 + $0x18] sm:$0xff] }
 0x115   : > { %v648_v32 = vmul.f32 1.125, %v644_v29  ;;  %v649_v33 = vmul.f32 1.125, %v645_v30  ;;  %v650_v34 = vmul.f32 1.125, %v646_v31 }
 0x117   : > { %652 = vst [vmem:[%s1596_s8] sm:$0xff] %v648_v32 }
 0x118   : > { %653 = vst [vmem:[%s1596_s8 + $0x8] sm:$0xff] %v649_v33 }
 0x119   : > { %654 = vst [vmem:[%s1596_s8 + $0x10] sm:$0xff] %v650_v34 }
 0x11a   : > { %v647_v35 = vld [vmem:[#allocation2 + $0x8] sm:$0xff] }
 0x11b   : > { %v651_v36 = vmul.f32 1.125, %v647_v35 }
 0x11d   : > { %655 = vst [vmem:[%s1596_s8 + $0x18] sm:$0xff] %v651_v36 }
 0x11e PF: > { %s1752_s3 = sld [smem:[#allocation14_spill]]  ;;  %s671_s15 = sshll.u32 %s1596_s8, 4  ;;  %s672_s15 = int_to_ptr.vmem [resolvable:$true] %s671_s15 }
 0x11f   : > { %s1753_s12 = sld [smem:[#allocation21_spill]]  ;;  %s657_s0 = scalar_lea.sflag [#allocation5], %s233_s24 }
 0x124   : > { %s969_s18 = sshll.u32 %s1752_s3, 3 }
 0x125   : > { %s1754_s25 = smov %s1753_s12  ;;  %s670_s30 = scalar_lea.hbm %s1753_s12, %s969_s18 }
 0x126   : > { %s673_s2 = sshll.u32 %s670_s30, 4  ;;  %s1235_s19 = scalar_lea.hbm %s1754_s25, 64  ;;  %s674_s2 = int_to_ptr.hbm [resolvable:$true] %s673_s2 }
 0x127   : > { %s1229_s5 = sshra.s32 %s674_s2, 4  ;;  %s1230_s5 = int_to_ptr.hbm [resolvable:$true] %s1229_s5 }
 0x128   : > { %s1231_s27 = scalar_lea.hbm %s1230_s5, 32  ;;  %p1236_p0 = scmp.lt.s32.totalorder %s1230_s5, %s1754_s25 }
 0x129   : > { %p1232_p4 = scmp.ne.s32.totalorder %s1230_s5, %s1231_s27  ;;  %p1237_p11 = scmp.lt.s32.totalorder %s1235_s19, %s1231_s27 }
 0x12b   : > { %p1233_p6 = pnand %p1232_p4, %p1553_p9  ;;  %p1238_p12 = por %p1237_p11, %p1236_p0 }
 0x12d   : > { %p1234_p10 = pneg %p1233_p6 }
 0x12f   : > { %p1239_p2 = pnand %p1238_p12, %p1234_p10 }
 0x131   : > { %1242 = shalt.err (!%p1239_p2)
}
 0x132   : > { %s1374_s24 = smov 128   ;;  %s1375_s7 = smov 256  }
 0x133   : > { %s1376_s8 = smov 8  }
 0x134   : > { %1018 = dma.vmem_to_hbm [thread:$0]  (%p1553_p9), %s672_s15, 512, %s674_s2, %s657_s0, %s1374_s24, %s1375_s7, %s1376_s8  }
 0x135 PF: > { %p1032_p1 = scmp.ge.s32.totalorder %s1365_s22, 2  ;;  %s688_s3 = sand.u32 1, %s1313_s9  }
 0x136   : > { %s689_s18 = scalar_lea.sflag [#allocation5], %s688_s3 }
 0x137   : > { %p1028_p7 = pnand %p1032_p1, %p1563_p5 }
 0x139   : > { %p1029_p3 = pneg %p1028_p7 }
 0x13b   : > { %1308 = dma.done.wait (%p1029_p3), %s689_s18, 512  }
 0x13c   : > { %1310 = vsyncadd (%p1029_p3), %s689_s18, 4294966784  ;;  %s21_s22 = sadd.s32 1, %s1365_s22   ;;  %s1756_s29 = sld [smem:[#allocation18_spill]] }
 0x13d   : > { %p1674_p8 = scmp.ge.s32.totalorder %s21_s22, 6   ;;  %s1757_s28 = sld [smem:[#allocation12_spill]] }
 0x13e   : > { %s1758_s14 = sld [smem:[#allocation19_spill]]  ;;  %s1763_s9 = smov %s1317_s10 }
 0x13f   : > { %s1759_s30 = sld [smem:[#allocation13_spill]]  ;;  %s1764_s10 = smov %s1321_s11 }
 0x140   : > { %s1760_s17 = sld [smem:[#allocation16_spill]]  ;;  %s1766_s12 = smov %s1329_s13 }
 0x141   : > { %s1761_s6 = sld [smem:[#allocation15_spill]]  ;;  %s1768_s15 = smov %s1341_s16 }
 0x142   : > { %s1762_s2 = sld [smem:[#allocation17_spill]]  ;;  %s1765_s11 = smov %s1756_s29 }
 0x143   : > { %s1767_s13 = smov %s1757_s28  ;;  %s1770_s18 = smov %s1357_s20 }
 0x144   : > { %s1771_s19 = smov %s1361_s21  ;;  %20 = sbr.rel (!%p1674_p8) target bundleno = 15 (0xf), region = 94 }
 0x145   : > { %s1769_s16 = smov %s1759_s30 }
 0x147   : > { %s1772_s20 = smov %s1761_s6 }
 0x148   : > { %s1773_s21 = smov %s1762_s2 }
 0x149   :  { %695 = vsyncpa [#allocation4], 1 }
 0x14a   :  { %697 = vsyncpa [#allocation4 + $0x1], 1 }
 0x14b   :  { %698 = vsyncpa [#allocation7], 1 }
 0x14c   :  { %700 = vsyncpa [#allocation7 + $0x1], 1 }
 0x14d   :  { %701 = vsyncpa [#allocation5], 1 }
 0x14e   :  { %703 = vsyncpa [#allocation5 + $0x1], 1 }

</bundles_post_ra>
